<compile_context>
chip_gen: v6e
topology: v6e:2x2x1
jax: 0.10.0
libtpu: 0.0.40
codegen_flags: <defaults>
</compile_context>

<pallas_src>
import functools

import jax
import jax.numpy as jnp
from jax.experimental import pallas as pl


LANES = 128
SUBLANES = 8
H1 = 256          # features layer-1 width
H2 = 128          # features layer-2 width == stream hidden width
N_OUT = 128       # lane-dense fused head output width (>= action_space + 1)
V_COL = N_OUT - 1 # column of the fused output that carries the value scalar


def _round_up(x, m):
    return (x + m - 1) // m * m


# ----------------------------------------------------------------------------
# Kernel
# ----------------------------------------------------------------------------
def dueling_dqn_kernel(x_ref, w1_ref, b1_ref, w2_ref, b2_ref,
                       wh_ref, bh_ref, wo_ref, bo_ref, q_ref,
                       *, batch, actions):
    # In-kernel bf16 cast of the raw f32 activations (no wrapper-side cast and
    # no extra HBM round-trip of x).
    x = x_ref[...].astype(jnp.bfloat16)

    # Shared trunk: Linear(obs, 256) -> ReLU -> Linear(256, 128) -> ReLU
    h = jnp.dot(x, w1_ref[...], preferred_element_type=jnp.float32) + b1_ref[...]
    h = jnp.maximum(h, 0.0)
    h = jnp.dot(h.astype(jnp.bfloat16), w2_ref[...],
                preferred_element_type=jnp.float32) + b2_ref[...]
    h = jnp.maximum(h, 0.0)

    # Fused stream hidden layer: [Bp, 256]  (cols 0:128 = value, 128:256 = advantage)
    heads = jnp.dot(h.astype(jnp.bfloat16), wh_ref[...],
                    preferred_element_type=jnp.float32) + bh_ref[...]
    heads = jnp.maximum(heads, 0.0)

    # Fused block-diagonal output layer: [Bp, 128]
    #   cols 0..A-1 = advantage, col V_COL = value, remaining cols exactly 0.
    out = jnp.dot(heads.astype(jnp.bfloat16), wo_ref[...],
                  preferred_element_type=jnp.float32) + bo_ref[...]

    # Global mean over batch AND actions (torch .mean() with no dim).
    # Mask out sublane-padding rows (batch < Bp) with a whole-vreg select so
    # the reduction stays exact and dense.
    if batch != out.shape[0]:
        rows = jax.lax.broadcasted_iota(jnp.int32, out.shape, 0)
        out_valid = jnp.where(rows < batch, out, 0.0)
    else:
        out_valid = out
    # Padded advantage columns (A..126) are exact zeros (zero weights and zero
    # bias), so full-row sum minus the value column == sum over the `actions`
    # real columns.
    a_sum = jnp.sum(out_valid) - jnp.sum(out_valid[:, V_COL:V_COL + 1])
    a_mean = a_sum * (1.0 / (batch * actions))

    v = out[:, V_COL:V_COL + 1]                       # [Bp, 1]
    # cols 0..A-1 hold the real q values; the rest (and padded rows) are
    # sliced off in the wrapper.
    q_ref[...] = v + (out - a_mean)


# ----------------------------------------------------------------------------
# Parameter packing (done once, outside the per-step call)
# ----------------------------------------------------------------------------
def pack_params(params, observation_space, action_space,
                weight_dtype=jnp.bfloat16):
    """Fuse the 6 nn.Linear layers into 4 lane-dense matmul operands."""
    (w1, b1, w2, b2, wv1, bv1, wv2, bv2, wa1, ba1, wa2, ba2) = params
    assert action_space + 1 <= N_OUT
    assert w1.shape == (observation_space, H1)

    # Fused stream hidden layer: [128, 256] / [1, 256]
    wh = jnp.concatenate([wv1, wa1], axis=1)
    bh = jnp.concatenate([bv1, ba1], axis=1)

    # Fused block-diagonal output layer: [256, 128] / [1, 128]
    wo = jnp.zeros((2 * H2, N_OUT), jnp.float32)
    wo = wo.at[:H2, V_COL].set(wv2[:, 0])             # value stream -> col V_COL
    wo = wo.at[H2:, :action_space].set(wa2)           # advantage   -> cols 0..A-1
    bo = jnp.zeros((1, N_OUT), jnp.float32)
    bo = bo.at[0, V_COL].set(bv2[0, 0])
    bo = bo.at[0, :action_space].set(ba2[0])

    wd = weight_dtype
    return (w1.astype(wd), b1.astype(jnp.float32),
            w2.astype(wd), b2.astype(jnp.float32),
            wh.astype(wd), bh.astype(jnp.float32),
            wo.astype(wd), bo.astype(jnp.float32))


# ----------------------------------------------------------------------------
# Forward wrapper (jitted so reshape / pad / final slice fuse around the kernel)
# ----------------------------------------------------------------------------
@functools.partial(jax.jit, static_argnames=("action_space",))
def dueling_dqn_forward(state_nchw, packed_params, *, action_space):
    """state_nchw: [B, C, H, W] float32. Returns q_values [B, action_space] (f32)."""
    B = state_nchw.shape[0]
    x = state_nchw.reshape(B, -1)                      # nn.Flatten(1), stays f32
    obs = x.shape[1]

    # Round the batch up to a sublane multiple so x loads / q stores are dense.
    # No-op whenever B % 8 == 0 (typical training batches).
    b_pad = _round_up(B, SUBLANES)
    if b_pad != B:
        x = jnp.pad(x, ((0, b_pad - B), (0, 0)))

    (w1, b1, w2, b2, wh, bh, wo, bo) = packed_params
    assert w1.shape[0] == obs, "packed params don't match observation size"

    operands = (x, w1, b1, w2, b2, wh, bh, wo, bo)

    flops = 2 * b_pad * (obs * H1 + H1 * H2 + H2 * (2 * H2) + (2 * H2) * N_OUT)
    bytes_accessed = int(sum(int(a.size) * a.dtype.itemsize for a in operands)
                         + b_pad * N_OUT * 4)

    kernel = functools.partial(dueling_dqn_kernel, batch=B, actions=action_space)

    # Single-block call: no grid, whole arrays resident in VMEM (~300 KiB of
    # bf16 weights + tiny activations — fits every generation incl. v7x).
    q_padded = pl.pallas_call(
        kernel,
        out_shape=jax.ShapeDtypeStruct((b_pad, N_OUT), jnp.float32),
        cost_estimate=pl.CostEstimate(flops=flops, transcendentals=0,
                                      bytes_accessed=bytes_accessed),
    )(*operands)

    # Fused under jit: no extra materialization of the tiny slice.
    return q_padded[:B, :action_space]


# ----------------------------------------------------------------------------
# Init + references
# ----------------------------------------------------------------------------
def init_params(key, observation_space, action_space):
    """Deterministic init mirroring the nn.Linear shapes (stored as [in, out])."""
    def linear(k, fan_in, fan_out):
        kw, kb = jax.random.split(k)
        bound = 1.0 / jnp.sqrt(fan_in)
        w = jax.random.uniform(kw, (fan_in, fan_out), jnp.float32, -bound, bound)
        b = jax.random.uniform(kb, (1, fan_out), jnp.float32, -bound, bound)
        return w, b

    keys = jax.random.split(key, 6)
    w1, b1 = linear(keys[0], observation_space, 256)
    w2, b2 = linear(keys[1], 256, 128)
    wv1, bv1 = linear(keys[2], 128, 128)
    wv2, bv2 = linear(keys[3], 128, 1)
    wa1, ba1 = linear(keys[4], 128, 128)
    wa2, ba2 = linear(keys[5], 128, action_space)
    return (w1, b1, w2, b2, wv1, bv1, wv2, bv2, wa1, ba1, wa2, ba2)


def reference_forward(state_nchw, params, matmul_dtype=jnp.float32):
    """Pure-JAX reference matching the PyTorch forward semantics.

    With matmul_dtype=bfloat16 it also mirrors the kernel's quantization (bf16
    matmul operands, f32 accumulation, f32 bias/ReLU)."""
    (w1, b1, w2, b2, wv1, bv1, wv2, bv2, wa1, ba1, wa2, ba2) = params

    def mm(a, w):
        return jnp.dot(a.astype(matmul_dtype), w.astype(matmul_dtype),
                       preferred_element_type=jnp.float32)

    x = state_nchw.reshape(state_nchw.shape[0], -1)
    h = jnp.maximum(mm(x, w1) + b1, 0.0)
    h = jnp.maximum(mm(h, w2) + b2, 0.0)
    v = mm(jnp.maximum(mm(h, wv1) + bv1, 0.0), wv2) + bv2
    a = mm(jnp.maximum(mm(h, wa1) + ba1, 0.0), wa2) + ba2
    return v + (a - jnp.mean(a))       # global mean, like torch .mean() with no dim


# ----------------------------------------------------------------------------
if __name__ == "__main__":
    B, C, H, W = 2, 4, 16, 16            # observation_space = C*H*W = 1024
    observation_space = C * H * W
    action_space = 6

    key = jax.random.PRNGKey(0)
    k_state, k_params = jax.random.split(key)
    state = jax.random.normal(k_state, (B, C, H, W), jnp.float32)

    params = init_params(k_params, observation_space, action_space)
    packed = pack_params(params, observation_space, action_space)

    q = dueling_dqn_forward(state, packed, action_space=action_space)
    q = jax.block_until_ready(q)

    # Tight check vs. a reference with identical bf16 quantization.
    q_ref_bf16 = reference_forward(state, params, matmul_dtype=jnp.bfloat16)
    # Loose sanity check vs. the full-f32 PyTorch-equivalent forward.
    q_ref_f32 = reference_forward(state, params, matmul_dtype=jnp.float32)

    assert q.shape == (B, action_space)
    assert jnp.allclose(q, q_ref_bf16, atol=1e-3, rtol=1e-2), "mismatch vs bf16 reference"
    assert jnp.allclose(q, q_ref_f32, atol=5e-2, rtol=5e-2), "mismatch vs f32 reference"
    print("KERNEL_OK")
</pallas_src>

<mosaic_0001>
module attributes {stable_mosaic.version = 11 : i64} {
  func.func @dueling_dqn_kernel(%arg0: memref<8x1024xf32, #tpu.memory_space<vmem>>, %arg1: memref<1024x256xbf16, #tpu.memory_space<vmem>>, %arg2: memref<1x256xf32, #tpu.memory_space<vmem>>, %arg3: memref<256x128xbf16, #tpu.memory_space<vmem>>, %arg4: memref<1x128xf32, #tpu.memory_space<vmem>>, %arg5: memref<128x256xbf16, #tpu.memory_space<vmem>>, %arg6: memref<1x256xf32, #tpu.memory_space<vmem>>, %arg7: memref<256x128xbf16, #tpu.memory_space<vmem>>, %arg8: memref<1x128xf32, #tpu.memory_space<vmem>>, %arg9: memref<8x128xf32, #tpu.memory_space<vmem>>) attributes {dimension_semantics = [], scalar_prefetch = 0 : i64, scratch_operands = 0 : i64, tpu.core_type = #tpu.core_type<tc>} {
    %c0 = arith.constant 0 : index
    %c0_0 = arith.constant 0 : index
    %0 = vector.load %arg0[%c0, %c0_0] : memref<8x1024xf32, #tpu.memory_space<vmem>>, vector<8x1024xf32>
    %1 = arith.truncf %0 : vector<8x1024xf32> to vector<8x1024xbf16>
    %c0_1 = arith.constant 0 : index
    %c0_2 = arith.constant 0 : index
    %2 = vector.load %arg1[%c0_1, %c0_2] : memref<1024x256xbf16, #tpu.memory_space<vmem>>, vector<1024x256xbf16>
    %cst = arith.constant dense<0.000000e+00> : vector<8x256xf32>
    %3 = tpu.matmul %1, %2, %cst {dimension_numbers = #tpu.dot_dimension_numbers<[1], [0], [0], [1], [0, 0, 1, 1], [], []>} : vector<8x1024xbf16>, vector<1024x256xbf16>, vector<8x256xf32> -> vector<8x256xf32>
    %c0_3 = arith.constant 0 : index
    %c0_4 = arith.constant 0 : index
    %4 = vector.load %arg2[%c0_3, %c0_4] : memref<1x256xf32, #tpu.memory_space<vmem>>, vector<1x256xf32>
    %5 = vector.broadcast %4 : vector<1x256xf32> to vector<8x256xf32>
    %6 = arith.addf %3, %5 : vector<8x256xf32>
    %cst_5 = arith.constant 0.000000e+00 : f32
    %7 = vector.broadcast %cst_5 : f32 to vector<8x256xf32>
    %8 = arith.maximumf %6, %7 : vector<8x256xf32>
    %9 = arith.truncf %8 : vector<8x256xf32> to vector<8x256xbf16>
    %c0_6 = arith.constant 0 : index
    %c0_7 = arith.constant 0 : index
    %10 = vector.load %arg3[%c0_6, %c0_7] : memref<256x128xbf16, #tpu.memory_space<vmem>>, vector<256x128xbf16>
    %cst_8 = arith.constant dense<0.000000e+00> : vector<8x128xf32>
    %11 = tpu.matmul %9, %10, %cst_8 {dimension_numbers = #tpu.dot_dimension_numbers<[1], [0], [0], [1], [0, 0, 1, 1], [], []>} : vector<8x256xbf16>, vector<256x128xbf16>, vector<8x128xf32> -> vector<8x128xf32>
    %c0_9 = arith.constant 0 : index
    %c0_10 = arith.constant 0 : index
    %12 = vector.load %arg4[%c0_9, %c0_10] : memref<1x128xf32, #tpu.memory_space<vmem>>, vector<1x128xf32>
    %13 = vector.broadcast %12 : vector<1x128xf32> to vector<8x128xf32>
    %14 = arith.addf %11, %13 : vector<8x128xf32>
    %cst_11 = arith.constant 0.000000e+00 : f32
    %15 = vector.broadcast %cst_11 : f32 to vector<8x128xf32>
    %16 = arith.maximumf %14, %15 : vector<8x128xf32>
    %17 = arith.truncf %16 : vector<8x128xf32> to vector<8x128xbf16>
    %c0_12 = arith.constant 0 : index
    %c0_13 = arith.constant 0 : index
    %18 = vector.load %arg5[%c0_12, %c0_13] : memref<128x256xbf16, #tpu.memory_space<vmem>>, vector<128x256xbf16>
    %cst_14 = arith.constant dense<0.000000e+00> : vector<8x256xf32>
    %19 = tpu.matmul %17, %18, %cst_14 {dimension_numbers = #tpu.dot_dimension_numbers<[1], [0], [0], [1], [0, 0, 1, 1], [], []>} : vector<8x128xbf16>, vector<128x256xbf16>, vector<8x256xf32> -> vector<8x256xf32>
    %c0_15 = arith.constant 0 : index
    %c0_16 = arith.constant 0 : index
    %20 = vector.load %arg6[%c0_15, %c0_16] : memref<1x256xf32, #tpu.memory_space<vmem>>, vector<1x256xf32>
    %21 = vector.broadcast %20 : vector<1x256xf32> to vector<8x256xf32>
    %22 = arith.addf %19, %21 : vector<8x256xf32>
    %cst_17 = arith.constant 0.000000e+00 : f32
    %23 = vector.broadcast %cst_17 : f32 to vector<8x256xf32>
    %24 = arith.maximumf %22, %23 : vector<8x256xf32>
    %25 = arith.truncf %24 : vector<8x256xf32> to vector<8x256xbf16>
    %c0_18 = arith.constant 0 : index
    %c0_19 = arith.constant 0 : index
    %26 = vector.load %arg7[%c0_18, %c0_19] : memref<256x128xbf16, #tpu.memory_space<vmem>>, vector<256x128xbf16>
    %cst_20 = arith.constant dense<0.000000e+00> : vector<8x128xf32>
    %27 = tpu.matmul %25, %26, %cst_20 {dimension_numbers = #tpu.dot_dimension_numbers<[1], [0], [0], [1], [0, 0, 1, 1], [], []>} : vector<8x256xbf16>, vector<256x128xbf16>, vector<8x128xf32> -> vector<8x128xf32>
    %c0_21 = arith.constant 0 : index
    %c0_22 = arith.constant 0 : index
    %28 = vector.load %arg8[%c0_21, %c0_22] : memref<1x128xf32, #tpu.memory_space<vmem>>, vector<1x128xf32>
    %29 = vector.broadcast %28 : vector<1x128xf32> to vector<8x128xf32>
    %30 = arith.addf %27, %29 : vector<8x128xf32>
    %31 = tpu.iota {dimensions = array<i32: 0>} : vector<8x128xi32>
    %c2_i32 = arith.constant 2 : i32
    %32 = vector.broadcast %c2_i32 : i32 to vector<8x128xi32>
    %33 = arith.cmpi slt, %31, %32 : vector<8x128xi32>
    %cst_23 = arith.constant 0.000000e+00 : f32
    %34 = vector.broadcast %cst_23 : f32 to vector<8x128xf32>
    %35 = arith.select %33, %30, %34 : vector<8x128xi1>, vector<8x128xf32>
    %36 = vector.shape_cast %35 : vector<8x128xf32> to vector<1x8x128xf32>
    %cst_24 = arith.constant dense<0.000000e+00> : vector<1xf32>
    %37 = vector.multi_reduction <add>, %36, %cst_24 [1, 2] : vector<1x8x128xf32> to vector<1xf32>
    %38 = vector.shape_cast %37 : vector<1xf32> to vector<1x1x1xf32>
    %39 = vector.extract %38[0, 0, 0] : f32 from vector<1x1x1xf32>
    %40 = vector.extract_strided_slice %35 {offsets = [0, 127], sizes = [8, 1], strides = [1, 1]} : vector<8x128xf32> to vector<8x1xf32>
    %41 = vector.shape_cast %40 : vector<8x1xf32> to vector<1x8x1xf32>
    %cst_25 = arith.constant dense<0.000000e+00> : vector<1xf32>
    %42 = vector.multi_reduction <add>, %41, %cst_25 [1, 2] : vector<1x8x1xf32> to vector<1xf32>
    %43 = vector.shape_cast %42 : vector<1xf32> to vector<1x1x1xf32>
    %44 = vector.extract %43[0, 0, 0] : f32 from vector<1x1x1xf32>
    %45 = arith.subf %39, %44 : f32
    %cst_26 = arith.constant 0.0833333358 : f32
    %46 = arith.mulf %45, %cst_26 : f32
    %47 = vector.extract_strided_slice %30 {offsets = [0, 127], sizes = [8, 1], strides = [1, 1]} : vector<8x128xf32> to vector<8x1xf32>
    %48 = vector.broadcast %46 : f32 to vector<8x128xf32>
    %49 = arith.subf %30, %48 : vector<8x128xf32>
    %50 = vector.broadcast %47 : vector<8x1xf32> to vector<8x128xf32>
    %51 = arith.addf %50, %49 : vector<8x128xf32>
    %c0_27 = arith.constant 0 : index
    %c0_28 = arith.constant 0 : index
    %52 = vector.load %arg9[%c0_27, %c0_28] : memref<8x128xf32, #tpu.memory_space<vmem>>, vector<8x128xf32>
    tpu.vector_store %arg9[%c0_27, %c0_28], %51 {strides = array<i32>} : memref<8x128xf32, #tpu.memory_space<vmem>>, vector<8x128xf32>,
    return
  }
}

</mosaic_0001>

<bundles_post_ra>
// kernel: dueling_dqn_forward.1
= control target key start
LH: loop header
LB: loop body
LE: loop exit
PB: predicated region body
PF: predicated region fallthrough
CT: control target
= control target key end

     0   :  { %14 = vsyncpa [#allocation3], 0  ;;  %s2307_s0 = inlined_call_operand.vmem [shape: f32[8,1024], index: 0, kind: input, shape index: {}]   ;;  %s2308_s1 = inlined_call_operand.hbm [shape: bf16[1024,256], index: 1, kind: input, shape index: {}]   ;;  %s2309_s2 = inlined_call_operand.vmem [shape: f32[1,256], index: 2, kind: input, shape index: {}]   ;;  %s2310_s3 = inlined_call_operand.vmem [shape: bf16[256,128], index: 3, kind: input, shape index: {}]   ;;  %s2311_s4 = inlined_call_operand.vmem [shape: f32[1,128], index: 4, kind: input, shape index: {}]   ;;  %s2312_s5 = inlined_call_operand.hbm [shape: bf16[128,256], index: 5, kind: input, shape index: {}]   ;;  %s2313_s6 = inlined_call_operand.vmem [shape: f32[1,256], index: 6, kind: input, shape index: {}]   ;;  %s2314_s7 = inlined_call_operand.hbm [shape: bf16[256,128], index: 7, kind: input, shape index: {}]   ;;  %s2315_s8 = inlined_call_operand.vmem [shape: f32[1,128], index: 8, kind: input, shape index: {}]   ;;  %s2316_s9 = inlined_call_operand.vmem [shape: f32[8,128], index: 9, kind: output, shape index: {}]  }
   0x1   :  { %15 = vsyncpa [#allocation5], 0  ;;  %s2138_s30 = smov [#allocation4]   ;;  %s2139_s11 = smov [#allocation2]  }
   0x2   :  { %s41_s10 = sshll.u32 %s2138_s30, 4  ;;  %s23_s12 = sshll.u32 %s2139_s11, 4  ;;  %s42_s10 = int_to_ptr.vmem [resolvable:$true] %s41_s10  ;;  %s24_s12 = int_to_ptr.vmem [resolvable:$true] %s23_s12 }
   0x3   :  { %s2082_s13 = scalar_lea.vmem %s42_s10, 2048  ;;  %p2087_p1 = scmp.lt.s32.totalorder %s42_s10, %s42_s10 }
   0x4   :  { %p2083_p0 = scmp.ne.s32.totalorder %s42_s10, %s2082_s13  ;;  %p2088_p2 = scmp.lt.s32.totalorder %s2082_s13, %s2082_s13 }
   0x6   :  { %p2089_p3 = por %p2088_p2, %p2087_p1 }
   0x8   :  { %p2090_p4 = pnand %p2089_p3, %p2083_p0 }
   0xa   :  { %2093 = shalt.err (!%p2090_p4)
}
   0xb   :  { %s2140_s14 = smov 128   ;;  %s2141_s15 = smov 8  }
   0xc   :  { %47 = dma.hbm_to_vmem [thread:$0]  %s2312_s5, 2048, %s42_s10, [#allocation5], %s2140_s14, %s2140_s14, %s2141_s15  }
   0xd   :  { %s2102_s18 = scalar_lea.vmem %s24_s12, 16384  ;;  %p2107_p6 = scmp.lt.s32.totalorder %s24_s12, %s24_s12 }
   0xe   :  { %p2103_p5 = scmp.ne.s32.totalorder %s24_s12, %s2102_s18  ;;  %p2108_p7 = scmp.lt.s32.totalorder %s2102_s18, %s2102_s18 }
  0x10   :  { %p2109_p8 = por %p2108_p7, %p2107_p6 }
  0x12   :  { %p2110_p9 = pnand %p2109_p8, %p2103_p5 }
  0x14   :  { %2113 = shalt.err (!%p2110_p9)
}
  0x15   :  { %29 = dma.hbm_to_vmem [thread:$0]  %s2308_s1, 16384, %s24_s12, [#allocation3], %s2140_s14, %s2140_s14, %s2141_s15  }
  0x16   :  { %s2142_s21 = smov [#allocation6]  }
  0x17   :  { %s55_s22 = sshll.u32 %s2142_s21, 4  ;;  %s56_s22 = int_to_ptr.vmem [resolvable:$true] %s55_s22 }
  0x18   :  { %s2122_s23 = scalar_lea.vmem %s56_s22, 2048  ;;  %p2127_p11 = scmp.lt.s32.totalorder %s56_s22, %s56_s22 }
  0x19   :  { %p2123_p10 = scmp.ne.s32.totalorder %s56_s22, %s2122_s23  ;;  %p2128_p12 = scmp.lt.s32.totalorder %s2122_s23, %s2122_s23 }
  0x1b   :  { %p2129_p13 = por %p2128_p12, %p2127_p11 }
  0x1d   :  { %p2130_p0 = pnand %p2129_p13, %p2123_p10 }
  0x1f   :  { %2133 = shalt.err (!%p2130_p0)
}
  0x20   :  { %s2143_s5 = smov 64   ;;  %s2144_s24 = smov 4  }
  0x21   :  { %61 = dma.hbm_to_vmem [thread:$0]  %s2314_s7, 2048, %s56_s22, [#allocation5], %s2143_s5, %s2143_s5, %s2144_s24  }
  0x22   :  { %2134 = dma.done.wait [#allocation3], 16384  }
  0x23   :  { %2135 = vsyncadd [#allocation3], 4294950912 }
  0x24   :  { %2136 = dma.done.wait [#allocation5], 4096  }
  0x25   :  { %2137 = vsyncadd [#allocation5], 4294963200  ;;  %v1826_v0 = vld [vmem:[#allocation2 + $0x74] ss:$8 sps:$4 sm:$0xff]   ;;  %v1830_v2 = vld [vmem:[#allocation2 + $0x70] ss:$8 sps:$4 sm:$0xff]  }
  0x26   :  { %v1828_v1 = vld [vmem:[#allocation2 + $0x174] ss:$8 sps:$4 sm:$0xff]   ;;  %870 = vmatprep.subr.bf16.mxu0 %v1826_v0  ;;  %v1831_v3 = vld [vmem:[#allocation2 + $0x170] ss:$8 sps:$4 sm:$0xff]   ;;  %v1832_v4 = vld [vmem:[#allocation2 + $0x64] ss:$8 sps:$4 sm:$0xff]  }
  0x27   :  { %911 = vmatprep.subr.bf16.mxu1 %v1828_v1  ;;  %871 = vmatpush1.bf16.msra.mxu0 %v1830_v2  ;;  %v1834_v5 = vld [vmem:[#allocation2 + $0x164] ss:$8 sps:$4 sm:$0xff]   ;;  %v1836_v6 = vld [vmem:[#allocation2 + $0x60] ss:$8 sps:$4 sm:$0xff]   ;;  %v1838_v8 = vld [vmem:[#allocation2 + $0x54] ss:$8 sps:$4 sm:$0xff]  }
  0x28   :  { %912 = vmatpush1.bf16.msra.mxu1 %v1831_v3  ;;  %872 = vmatprep.subr.bf16.mxu0 %v1832_v4  ;;  %v1837_v7 = vld [vmem:[#allocation2 + $0x160] ss:$8 sps:$4 sm:$0xff]   ;;  %v1840_v9 = vld [vmem:[#allocation2 + $0x154] ss:$8 sps:$4 sm:$0xff]   ;;  %v1842_v10 = vld [vmem:[#allocation2 + $0x50] ss:$8 sps:$4 sm:$0xff]  }
  0x29   :  { %913 = vmatprep.subr.bf16.mxu1 %v1834_v5  ;;  %v1843_v11 = vld [vmem:[#allocation2 + $0x150] ss:$8 sps:$4 sm:$0xff]   ;;  %v1844_v12 = vld [vmem:[#allocation2 + $0x44] ss:$8 sps:$4 sm:$0xff]   ;;  %v1848_v14 = vld [vmem:[#allocation2 + $0x40] ss:$8 sps:$4 sm:$0xff]  }
  0x2a   :  { %v1846_v13 = vld [vmem:[#allocation2 + $0x144] ss:$8 sps:$4 sm:$0xff]   ;;  %v1849_v15 = vld [vmem:[#allocation2 + $0x140] ss:$8 sps:$4 sm:$0xff]   ;;  %v1850_v16 = vld [vmem:[#allocation2 + $0x34] ss:$8 sps:$4 sm:$0xff]  }
  0x2b   :  { %873 = vmatpush1.bf16.msra.mxu0 %v1836_v6  ;;  %v1852_v17 = vld [vmem:[#allocation2 + $0x134] ss:$8 sps:$4 sm:$0xff]   ;;  %v1854_v18 = vld [vmem:[#allocation2 + $0x30] ss:$8 sps:$4 sm:$0xff]   ;;  %v1856_v20 = vld [vmem:[#allocation2 + $0x24] ss:$8 sps:$4 sm:$0xff]  }
  0x2c   :  { %914 = vmatpush1.bf16.msra.mxu1 %v1837_v7  ;;  %874 = vmatprep.subr.bf16.mxu0 %v1838_v8  ;;  %v1855_v19 = vld [vmem:[#allocation2 + $0x130] ss:$8 sps:$4 sm:$0xff]   ;;  %v1858_v21 = vld [vmem:[#allocation2 + $0x124] ss:$8 sps:$4 sm:$0xff]   ;;  %v1860_v22 = vld [vmem:[#allocation2 + $0x20] ss:$8 sps:$4 sm:$0xff]  }
  0x2d   :  { %915 = vmatprep.subr.bf16.mxu1 %v1840_v9  ;;  %v1861_v23 = vld [vmem:[#allocation2 + $0x120] ss:$8 sps:$4 sm:$0xff]   ;;  %v1862_v24 = vld [vmem:[#allocation2 + $0x14] ss:$8 sps:$4 sm:$0xff]   ;;  %v1866_v26 = vld [vmem:[#allocation2 + $0x10] ss:$8 sps:$4 sm:$0xff]  }
  0x2e   :  { %v1864_v25 = vld [vmem:[#allocation2 + $0x114] ss:$8 sps:$4 sm:$0xff]   ;;  %v1867_v27 = vld [vmem:[#allocation2 + $0x110] ss:$8 sps:$4 sm:$0xff]   ;;  %v1868_v28 = vld [vmem:[#allocation2 + $0x4] ss:$8 sps:$4 sm:$0xff]  }
  0x2f   :  { %875 = vmatpush1.bf16.msra.mxu0 %v1842_v10  ;;  %v1870_v29 = vld [vmem:[#allocation2 + $0x104] ss:$8 sps:$4 sm:$0xff]   ;;  %v1872_v30 = vld [vmem:[#allocation2] ss:$8 sps:$4 sm:$0xff]   ;;  %v1874_v32 = vld [vmem:[#allocation2 + $0xf4] ss:$8 sps:$4 sm:$0xff]  }
  0x30   :  { %916 = vmatpush1.bf16.msra.mxu1 %v1843_v11  ;;  %876 = vmatprep.subr.bf16.mxu0 %v1844_v12  ;;  %v1873_v31 = vld [vmem:[#allocation2 + $0x100] ss:$8 sps:$4 sm:$0xff]   ;;  %v1876_v33 = vld [vmem:[#allocation2 + $0x1f4] ss:$8 sps:$4 sm:$0xff]   ;;  %v1878_v34 = vld [vmem:[#allocation2 + $0xf0] ss:$8 sps:$4 sm:$0xff]  }
  0x31   :  { %917 = vmatprep.subr.bf16.mxu1 %v1846_v13  ;;  %v1879_v35 = vld [vmem:[#allocation2 + $0x1f0] ss:$8 sps:$4 sm:$0xff]   ;;  %v1880_v36 = vld [vmem:[#allocation2 + $0xe4] ss:$8 sps:$4 sm:$0xff]   ;;  %v1884_v38 = vld [vmem:[#allocation2 + $0xe0] ss:$8 sps:$4 sm:$0xff]  }
  0x32   :  { %v1882_v37 = vld [vmem:[#allocation2 + $0x1e4] ss:$8 sps:$4 sm:$0xff]   ;;  %v1885_v39 = vld [vmem:[#allocation2 + $0x1e0] ss:$8 sps:$4 sm:$0xff]   ;;  %v1886_v40 = vld [vmem:[#allocation2 + $0xd4] ss:$8 sps:$4 sm:$0xff]  }
  0x33   :  { %877 = vmatpush1.bf16.msra.mxu0 %v1848_v14  ;;  %v1888_v41 = vld [vmem:[#allocation2 + $0x1d4] ss:$8 sps:$4 sm:$0xff]   ;;  %v1890_v42 = vld [vmem:[#allocation2 + $0xd0] ss:$8 sps:$4 sm:$0xff]   ;;  %v1892_v44 = vld [vmem:[#allocation2 + $0xc4] ss:$8 sps:$4 sm:$0xff]  }
  0x34   :  { %918 = vmatpush1.bf16.msra.mxu1 %v1849_v15  ;;  %878 = vmatprep.subr.bf16.mxu0 %v1850_v16  ;;  %v1891_v43 = vld [vmem:[#allocation2 + $0x1d0] ss:$8 sps:$4 sm:$0xff]   ;;  %v1894_v45 = vld [vmem:[#allocation2 + $0x1c4] ss:$8 sps:$4 sm:$0xff]   ;;  %v1896_v47 = vld [vmem:[#allocation2 + $0xc0] ss:$8 sps:$4 sm:$0xff]  }
  0x35   :  { %919 = vmatprep.subr.bf16.mxu1 %v1852_v17  ;;  %v75_v46 = vld [vmem:[%s2307_s0 + $0x8] sm:$0xff]  ;;  %v77_v50 = vld [vmem:[%s2307_s0 + $0x18] sm:$0xff]  ;;  %v74_v4 = vld [vmem:[%s2307_s0] sm:$0xff]  ;;  %s2147_s27 = smov 1   ;;  %vm1560_vm1 = vcmask 7168  }
  0x36   :  { %v1897_v48 = vld [vmem:[#allocation2 + $0x1c0] ss:$8 sps:$4 sm:$0xff]   ;;  %v83_v49 = vpack.c.bf16 %v75_v46, %v75_v46  ;;  %v1898_v51 = vld [vmem:[#allocation2 + $0xb4] ss:$8 sps:$4 sm:$0xff]   ;;  %v85_v52 = vpack.c.bf16 %v77_v50, %v77_v50  ;;  %v1902_v54 = vld [vmem:[#allocation2 + $0xb0] ss:$8 sps:$4 sm:$0xff]   ;;  %v82_v8 = vpack.c.bf16 %v74_v4, %v74_v4 }
  0x37   :  { %879 = vmatpush1.bf16.msra.mxu0 %v1854_v18  ;;  %v1900_v53 = vld [vmem:[#allocation2 + $0x1b4] ss:$8 sps:$4 sm:$0xff]   ;;  %v1903_v55 = vld [vmem:[#allocation2 + $0x1b0] ss:$8 sps:$4 sm:$0xff]   ;;  %v1904_v56 = vld [vmem:[#allocation2 + $0xa4] ss:$8 sps:$4 sm:$0xff]  }
  0x38   :  { %920 = vmatpush1.bf16.msra.mxu1 %v1855_v19  ;;  %880 = vmatprep.subr.bf16.mxu0 %v1856_v20  ;;  %v1906_v57 = vld [vmem:[#allocation2 + $0x1a4] ss:$8 sps:$4 sm:$0xff]   ;;  %v1908_v58 = vld [vmem:[#allocation2 + $0xa0] ss:$8 sps:$4 sm:$0xff]   ;;  %v1910_v60 = vld [vmem:[#allocation2 + $0x94] ss:$8 sps:$4 sm:$0xff]  }
  0x39   :  { %921 = vmatprep.subr.bf16.mxu1 %v1858_v21  ;;  %902 = vmatprep.mubr.bf16.mxu0 %v83_v49  ;;  %v1909_v59 = vld [vmem:[#allocation2 + $0x1a0] ss:$8 sps:$4 sm:$0xff]   ;;  %v1912_v61 = vld [vmem:[#allocation2 + $0x194] ss:$8 sps:$4 sm:$0xff]   ;;  %v1914_v62 = vld [vmem:[#allocation2 + $0x90] ss:$8 sps:$4 sm:$0xff]  }
  0x3a   :  { %943 = vmatprep.mubr.bf16.mxu1 %v85_v52  ;;  %v1915_v63 = vld [vmem:[#allocation2 + $0x190] ss:$8 sps:$4 sm:$0xff]   ;;  %v1916_v0 = vld [vmem:[#allocation2 + $0x84] ss:$8 sps:$4 sm:$0xff]   ;;  %v1920_v2 = vld [vmem:[#allocation2 + $0x80] ss:$8 sps:$4 sm:$0xff]  }
  0x3b   :  { %881 = vmatpush1.bf16.msra.mxu0 %v1860_v22  ;;  %v1918_v1 = vld [vmem:[#allocation2 + $0x184] ss:$8 sps:$4 sm:$0xff]   ;;  %v1921_v3 = vld [vmem:[#allocation2 + $0x180] ss:$8 sps:$4 sm:$0xff]   ;;  %v76_v5 = vld [vmem:[%s2307_s0 + $0x10] sm:$0xff] }
  0x3c   :  { %922 = vmatpush1.bf16.msra.mxu1 %v1861_v23  ;;  %882 = vmatprep.subr.bf16.mxu0 %v1862_v24  ;;  %v1924_v6 = vld [vmem:[#allocation2 + $0x274] ss:$8 sps:$4 sm:$0xff]   ;;  %v84_v9 = vpack.c.bf16 %v76_v5, %v76_v5  ;;  %v1922_v10 = vld [vmem:[#allocation2 + $0x270] ss:$8 sps:$4 sm:$0xff]   ;;  %v1930_v12 = vld [vmem:[#allocation2 + $0x264] ss:$8 sps:$4 sm:$0xff]  }
  0x3d   :  { %923 = vmatprep.subr.bf16.mxu1 %v1864_v25  ;;  %v1927_v7 = vld [vmem:[#allocation2 + $0x374] ss:$8 sps:$4 sm:$0xff]   ;;  %v1925_v11 = vld [vmem:[#allocation2 + $0x370] ss:$8 sps:$4 sm:$0xff]   ;;  %v1933_v13 = vld [vmem:[#allocation2 + $0x364] ss:$8 sps:$4 sm:$0xff]  }
  0x3e   :  { %v1928_v14 = vld [vmem:[#allocation2 + $0x260] ss:$8 sps:$4 sm:$0xff]   ;;  %v1936_v16 = vld [vmem:[#allocation2 + $0x254] ss:$8 sps:$4 sm:$0xff]   ;;  %v1934_v18 = vld [vmem:[#allocation2 + $0x250] ss:$8 sps:$4 sm:$0xff]  }
  0x3f   :  { %883 = vmatpush1.bf16.msra.mxu0 %v1866_v26  ;;  %v1931_v15 = vld [vmem:[#allocation2 + $0x360] ss:$8 sps:$4 sm:$0xff]   ;;  %v1939_v17 = vld [vmem:[#allocation2 + $0x354] ss:$8 sps:$4 sm:$0xff]   ;;  %v1937_v19 = vld [vmem:[#allocation2 + $0x350] ss:$8 sps:$4 sm:$0xff]  }
  0x40   :  { %924 = vmatpush1.bf16.msra.mxu1 %v1867_v27  ;;  %884 = vmatprep.subr.bf16.mxu0 %v1868_v28  ;;  %v1942_v20 = vld [vmem:[#allocation2 + $0x244] ss:$8 sps:$4 sm:$0xff]   ;;  %v1940_v22 = vld [vmem:[#allocation2 + $0x240] ss:$8 sps:$4 sm:$0xff]   ;;  %v1948_v24 = vld [vmem:[#allocation2 + $0x234] ss:$8 sps:$4 sm:$0xff]  }
  0x41   :  { %925 = vmatprep.subr.bf16.mxu1 %v1870_v29  ;;  %v1945_v21 = vld [vmem:[#allocation2 + $0x344] ss:$8 sps:$4 sm:$0xff]   ;;  %v1943_v23 = vld [vmem:[#allocation2 + $0x340] ss:$8 sps:$4 sm:$0xff]   ;;  %v1951_v25 = vld [vmem:[#allocation2 + $0x334] ss:$8 sps:$4 sm:$0xff]  }
  0x42   :  { %v1946_v26 = vld [vmem:[#allocation2 + $0x230] ss:$8 sps:$4 sm:$0xff]   ;;  %v1954_v28 = vld [vmem:[#allocation2 + $0x224] ss:$8 sps:$4 sm:$0xff]   ;;  %v1976_v50 = vld [vmem:[#allocation2 + $0x2e0] ss:$8 sps:$4 sm:$0xff]  }
  0x43   :  { %885 = vmatpush1.bf16.msra.mxu0 %v1872_v30  ;;  %v1949_v27 = vld [vmem:[#allocation2 + $0x330] ss:$8 sps:$4 sm:$0xff]   ;;  %v1957_v29 = vld [vmem:[#allocation2 + $0x324] ss:$8 sps:$4 sm:$0xff]   ;;  %v1952_v30 = vld [vmem:[#allocation2 + $0x220] ss:$8 sps:$4 sm:$0xff]  }
  0x44   :  { %926 = vmatpush1.bf16.msra.mxu1 %v1873_v31  ;;  %886 = vmatprep.subr.bf16.mxu0 %v1874_v32  ;;  %v1955_v31 = vld [vmem:[#allocation2 + $0x320] ss:$8 sps:$4 sm:$0xff]   ;;  %v1960_v32 = vld [vmem:[#allocation2 + $0x214] ss:$8 sps:$4 sm:$0xff]   ;;  %v1970_v46 = vld [vmem:[#allocation2 + $0x2f0] ss:$8 sps:$4 sm:$0xff]  }
  0x45   :  { %927 = vmatprep.subr.bf16.mxu1 %v1876_v33  ;;  %v1963_v33 = vld [vmem:[#allocation2 + $0x314] ss:$8 sps:$4 sm:$0xff]   ;;  %v1981_v49 = vld [vmem:[#allocation2 + $0x3e4] ss:$8 sps:$4 sm:$0xff]  }
  0x46   :  { %v1984_v52 = vld [vmem:[#allocation2 + $0x2d4] ss:$8 sps:$4 sm:$0xff]  }
  0x47   :  { %887 = vmatpush2.bf16.msra.mxu0 %v1878_v34  ;;  %v1958_v34 = vld [vmem:[#allocation2 + $0x210] ss:$8 sps:$4 sm:$0xff]   ;;  %v2008_v4 = vld [vmem:[#allocation2 + $0x294] ss:$8 sps:$4 sm:$0xff]  }
  0x48   :  { %928 = vmatpush2.bf16.msra.mxu1 %v1879_v35  ;;  %888 = vmatprep.subr.bf16.mxu0 %v1880_v36  ;;  %v79_v35 = vld [vmem:[%s2307_s0 + $0x28] sm:$0xff]  ;;  %v1961_v36 = vld [vmem:[#allocation2 + $0x310] ss:$8 sps:$4 sm:$0xff]   ;;  %v2011_v5 = vld [vmem:[#allocation2 + $0x394] ss:$8 sps:$4 sm:$0xff]  }
  0x49   :  { %929 = vmatprep.subr.bf16.mxu1 %v1882_v37  ;;  %v1966_v37 = vld [vmem:[#allocation2 + $0x204] ss:$8 sps:$4 sm:$0xff]  }
  0x4b   :  { %889 = vmatpush2.bf16.msra.mxu0 %v1884_v38  ;;  %v87_v38 = vpack.c.bf16 %v79_v35, %v79_v35  ;;  %v2037_v35 = vld [vmem:[#allocation4 + $0x60] ss:$8 sps:$4 sm:$0xff]  }
  0x4c   :  { %930 = vmatpush2.bf16.msra.mxu1 %v1885_v39  ;;  %890 = vmatprep.subr.bf16.mxu0 %v1886_v40  ;;  %v81_v39 = vld [vmem:[%s2307_s0 + $0x38] sm:$0xff]  ;;  %v1969_v40 = vld [vmem:[#allocation2 + $0x304] ss:$8 sps:$4 sm:$0xff]  }
  0x4d   :  { %931 = vmatprep.subr.bf16.mxu1 %v1888_v41  ;;  %v89_v41 = vpack.c.bf16 %v81_v39, %v81_v39  ;;  %v2043_v39 = vld [vmem:[#allocation4 + $0x40] ss:$8 sps:$4 sm:$0xff]  }
  0x4f   :  { %891 = vmatpush2.bf16.msra.mxu0 %v1890_v42  ;;  %v1964_v42 = vld [vmem:[#allocation2 + $0x200] ss:$8 sps:$4 sm:$0xff]  }
  0x50   :  { %932 = vmatpush2.bf16.msra.mxu1 %v1891_v43  ;;  %892 = vmatprep.subr.bf16.mxu0 %v1892_v44  ;;  %v1967_v43 = vld [vmem:[#allocation2 + $0x300] ss:$8 sps:$4 sm:$0xff]   ;;  %v1972_v44 = vld [vmem:[#allocation2 + $0x2f4] ss:$8 sps:$4 sm:$0xff]  }
  0x51   :  { %933 = vmatprep.subr.bf16.mxu1 %v1894_v45  ;;  %v1975_v45 = vld [vmem:[#allocation2 + $0x3f4] ss:$8 sps:$4 sm:$0xff]  }
  0x53   :  { %893 = vmatpush2.bf16.msra.mxu0 %v1896_v47  ;;  %v1973_v47 = vld [vmem:[#allocation2 + $0x3f0] ss:$8 sps:$4 sm:$0xff]  }
  0x54   :  { %934 = vmatpush2.bf16.msra.mxu1 %v1897_v48  ;;  %894 = vmatprep.subr.bf16.mxu0 %v1898_v51  ;;  %v1978_v48 = vld [vmem:[#allocation2 + $0x2e4] ss:$8 sps:$4 sm:$0xff]   ;;  %v1979_v51 = vld [vmem:[#allocation2 + $0x3e0] ss:$8 sps:$4 sm:$0xff]  }
  0x55   :  { %935 = vmatprep.subr.bf16.mxu1 %v1900_v53  ;;  %v1987_v53 = vld [vmem:[#allocation2 + $0x3d4] ss:$8 sps:$4 sm:$0xff]  }
  0x57   :  { %895 = vmatpush2.bf16.msra.mxu0 %v1902_v54  ;;  %v1982_v54 = vld [vmem:[#allocation2 + $0x2d0] ss:$8 sps:$4 sm:$0xff]  }
  0x58   :  { %936 = vmatpush2.bf16.msra.mxu1 %v1903_v55  ;;  %896 = vmatprep.subr.bf16.mxu0 %v1904_v56  ;;  %v1985_v55 = vld [vmem:[#allocation2 + $0x3d0] ss:$8 sps:$4 sm:$0xff]   ;;  %v1990_v56 = vld [vmem:[#allocation2 + $0x2c4] ss:$8 sps:$4 sm:$0xff]  }
  0x59   :  { %937 = vmatprep.subr.bf16.mxu1 %v1906_v57  ;;  %v1993_v57 = vld [vmem:[#allocation2 + $0x3c4] ss:$8 sps:$4 sm:$0xff]  }
  0x5b   :  { %897 = vmatpush2.bf16.msra.mxu0 %v1908_v58  ;;  %v1988_v58 = vld [vmem:[#allocation2 + $0x2c0] ss:$8 sps:$4 sm:$0xff]  }
  0x5c   :  { %938 = vmatpush2.bf16.msra.mxu1 %v1909_v59  ;;  %898 = vmatprep.subr.bf16.mxu0 %v1910_v60  ;;  %v1991_v59 = vld [vmem:[#allocation2 + $0x3c0] ss:$8 sps:$4 sm:$0xff]   ;;  %v1996_v60 = vld [vmem:[#allocation2 + $0x2b4] ss:$8 sps:$4 sm:$0xff]  }
  0x5d   :  { %939 = vmatprep.subr.bf16.mxu1 %v1912_v61  ;;  %v1999_v61 = vld [vmem:[#allocation2 + $0x3b4] ss:$8 sps:$4 sm:$0xff]  }
  0x5f   :  { %899 = vmatpush2.bf16.msra.mxu0 %v1914_v62  ;;  %v1994_v62 = vld [vmem:[#allocation2 + $0x2b0] ss:$8 sps:$4 sm:$0xff]  }
  0x60   :  { %940 = vmatpush2.bf16.msra.mxu1 %v1915_v63  ;;  %900 = vmatprep.subr.bf16.mxu0 %v1916_v0  ;;  %v1997_v63 = vld [vmem:[#allocation2 + $0x3b0] ss:$8 sps:$4 sm:$0xff]   ;;  %v2002_v0 = vld [vmem:[#allocation2 + $0x2a4] ss:$8 sps:$4 sm:$0xff]  }
  0x61   :  { %941 = vmatprep.subr.bf16.mxu1 %v1918_v1  ;;  %v2005_v1 = vld [vmem:[#allocation2 + $0x3a4] ss:$8 sps:$4 sm:$0xff]  }
  0x63   :  { %901 = vmatpush2.bf16.msra.mxu0 %v1920_v2  ;;  %v2000_v2 = vld [vmem:[#allocation2 + $0x2a0] ss:$8 sps:$4 sm:$0xff]  }
  0x64   :  { %942 = vmatpush2.bf16.msra.mxu1 %v1921_v3  ;;  %952 = vmatprep.subr.bf16.mxu0 %v1924_v6  ;;  %v2003_v3 = vld [vmem:[#allocation2 + $0x3a0] ss:$8 sps:$4 sm:$0xff]   ;;  %v2006_v6 = vld [vmem:[#allocation2 + $0x290] ss:$8 sps:$4 sm:$0xff]  }
  0x65   :  { %993 = vmatprep.subr.bf16.mxu1 %v1927_v7  ;;  %v2009_v7 = vld [vmem:[#allocation2 + $0x390] ss:$8 sps:$4 sm:$0xff]  }
  0x66   :  { %903 = vmatmul.mubr.bf16.vlgmr.msra.gmra.mxu0 %v82_v8  ;;  %v2014_v8 = vld [vmem:[#allocation2 + $0x284] ss:$8 sps:$4 sm:$0xff]  }
  0x67   :  { %944 = vmatmul.mubr.bf16.vlgmr.msra.gmra.mxu1 %v84_v9  ;;  %953 = vmatpush1.bf16.msra.mxu0 %v1922_v10  ;;  %v2017_v9 = vld [vmem:[#allocation2 + $0x384] ss:$8 sps:$4 sm:$0xff]   ;;  %v2012_v10 = vld [vmem:[#allocation2 + $0x280] ss:$8 sps:$4 sm:$0xff]  }
  0x68   :  { %994 = vmatpush1.bf16.msra.mxu1 %v1925_v11  ;;  %954 = vmatprep.subr.bf16.mxu0 %v1930_v12  ;;  %v2015_v11 = vld [vmem:[#allocation2 + $0x380] ss:$8 sps:$4 sm:$0xff]  }
  0x69   :  { %995 = vmatprep.subr.bf16.mxu1 %v1933_v13  ;;  %984 = vmatprep.mubr.bf16.mxu0 %v87_v38  ;;  %v78_v12 = vld [vmem:[%s2307_s0 + $0x20] sm:$0xff]  ;;  %v80_v13 = vld [vmem:[%s2307_s0 + $0x30] sm:$0xff] }
  0x6a   :  { %1025 = vmatprep.mubr.bf16.mxu1 %v89_v41  ;;  %v2045_v38 = vld [vmem:[#allocation4 + $0x44] ss:$8 sps:$4 sm:$0xff]   ;;  %v2046_v41 = vld [vmem:[#allocation4 + $0x30] ss:$8 sps:$4 sm:$0xff]  }
  0x6b   :  { %955 = vmatpush1.bf16.msra.mxu0 %v1928_v14  ;;  %v86_v14 = vpack.c.bf16 %v78_v12, %v78_v12 }
  0x6c   :  { %996 = vmatpush1.bf16.msra.mxu1 %v1931_v15  ;;  %956 = vmatprep.subr.bf16.mxu0 %v1936_v16  ;;  %v88_v15 = vpack.c.bf16 %v80_v13, %v80_v13  ;;  %v2018_v16 = vld [vmem:[%s2310_s3 + $0x78] sm:$0xff]  }
  0x6d   :  { %997 = vmatprep.subr.bf16.mxu1 %v1939_v17  ;;  %v2019_v17 = vld [vmem:[%s2310_s3 + $0x38] sm:$0xff]  }
  0x6f   :  { %957 = vmatpush1.bf16.msra.mxu0 %v1934_v18  ;;  %v2020_v18 = vld [vmem:[%s2310_s3 + $0x70] sm:$0xff]  }
  0x70   :  { %998 = vmatpush1.bf16.msra.mxu1 %v1937_v19  ;;  %958 = vmatprep.subr.bf16.mxu0 %v1942_v20  ;;  %v2021_v19 = vld [vmem:[%s2310_s3 + $0x30] sm:$0xff]   ;;  %v2022_v20 = vld [vmem:[%s2310_s3 + $0x68] sm:$0xff]  }
  0x71   :  { %999 = vmatprep.subr.bf16.mxu1 %v1945_v21  ;;  %v2023_v21 = vld [vmem:[%s2310_s3 + $0x28] sm:$0xff]  }
  0x73   :  { %959 = vmatpush1.bf16.msra.mxu0 %v1940_v22  ;;  %v2024_v22 = vld [vmem:[%s2310_s3 + $0x60] sm:$0xff]  }
  0x74   :  { %1000 = vmatpush1.bf16.msra.mxu1 %v1943_v23  ;;  %960 = vmatprep.subr.bf16.mxu0 %v1948_v24  ;;  %v2025_v23 = vld [vmem:[%s2310_s3 + $0x20] sm:$0xff]   ;;  %v2026_v24 = vld [vmem:[%s2310_s3 + $0x58] sm:$0xff]  }
  0x75   :  { %1001 = vmatprep.subr.bf16.mxu1 %v1951_v25  ;;  %v2027_v25 = vld [vmem:[%s2310_s3 + $0x18] sm:$0xff]  }
  0x77   :  { %961 = vmatpush1.bf16.msra.mxu0 %v1946_v26  ;;  %v2028_v26 = vld [vmem:[%s2310_s3 + $0x50] sm:$0xff]  }
  0x78   :  { %1002 = vmatpush1.bf16.msra.mxu1 %v1949_v27  ;;  %962 = vmatprep.subr.bf16.mxu0 %v1954_v28  ;;  %v2029_v27 = vld [vmem:[%s2310_s3 + $0x10] sm:$0xff]   ;;  %v2030_v28 = vld [vmem:[%s2310_s3 + $0x48] sm:$0xff]  }
  0x79   :  { %1003 = vmatprep.subr.bf16.mxu1 %v1957_v29  ;;  %v2031_v29 = vld [vmem:[%s2310_s3 + $0x8] sm:$0xff]  }
  0x7b   :  { %963 = vmatpush1.bf16.msra.mxu0 %v1952_v30  ;;  %v2032_v30 = vld [vmem:[%s2310_s3 + $0x40] sm:$0xff]  }
  0x7c   :  { %1004 = vmatpush1.bf16.msra.mxu1 %v1955_v31  ;;  %964 = vmatprep.subr.bf16.mxu0 %v1960_v32  ;;  %v2033_v31 = vld [vmem:[%s2310_s3] sm:$0xff]   ;;  %v2034_v32 = vld [vmem:[#allocation4 + $0x70] ss:$8 sps:$4 sm:$0xff]  }
  0x7d   :  { %1005 = vmatprep.subr.bf16.mxu1 %v1963_v33  ;;  %v2036_v33 = vld [vmem:[#allocation4 + $0x74] ss:$8 sps:$4 sm:$0xff]  }
  0x7f   :  { %965 = vmatpush1.bf16.msra.mxu0 %v1958_v34  ;;  %v2039_v34 = vld [vmem:[#allocation4 + $0x64] ss:$8 sps:$4 sm:$0xff]  }
  0x80   :  { %1006 = vmatpush1.bf16.msra.mxu1 %v1961_v36  ;;  %966 = vmatprep.subr.bf16.mxu0 %v1966_v37  ;;  %v2042_v36 = vld [vmem:[#allocation4 + $0x54] ss:$8 sps:$4 sm:$0xff]   ;;  %v2040_v37 = vld [vmem:[#allocation4 + $0x50] ss:$8 sps:$4 sm:$0xff]  }
  0x81   :  { %1007 = vmatprep.subr.bf16.mxu1 %v1969_v40  ;;  %v2048_v40 = vld [vmem:[#allocation4 + $0x34] ss:$8 sps:$4 sm:$0xff]  }
  0x83   :  { %967 = vmatpush1.bf16.msra.mxu0 %v1964_v42  ;;  %v2051_v42 = vld [vmem:[#allocation4 + $0x24] ss:$8 sps:$4 sm:$0xff]  }
  0x84   :  { %1008 = vmatpush1.bf16.msra.mxu1 %v1967_v43  ;;  %968 = vmatprep.subr.bf16.mxu0 %v1972_v44  ;;  %v2049_v43 = vld [vmem:[#allocation4 + $0x20] ss:$8 sps:$4 sm:$0xff]  }
  0x85   :  { %1009 = vmatprep.subr.bf16.mxu1 %v1975_v45 }
  0x87   :  { %969 = vmatpush2.bf16.msra.mxu0 %v1970_v46 }
  0x88   :  { %1010 = vmatpush2.bf16.msra.mxu1 %v1973_v47  ;;  %970 = vmatprep.subr.bf16.mxu0 %v1978_v48 }
  0x89   :  { %1011 = vmatprep.subr.bf16.mxu1 %v1981_v49 }
  0x8b   :  { %971 = vmatpush2.bf16.msra.mxu0 %v1976_v50 }
  0x8c   :  { %1012 = vmatpush2.bf16.msra.mxu1 %v1979_v51  ;;  %972 = vmatprep.subr.bf16.mxu0 %v1984_v52  ;;  %v220_v52 = vlaneseq }
  0x8d   :  { %1013 = vmatprep.subr.bf16.mxu1 %v1987_v53 }
  0x8e   :  { %v2279_v53 = vshrl.u32 %v220_v52, 7 }
  0x8f   :  { %973 = vmatpush2.bf16.msra.mxu0 %v1982_v54 }
  0x90   :  { %1014 = vmatpush2.bf16.msra.mxu1 %v1985_v55  ;;  %974 = vmatprep.subr.bf16.mxu0 %v1990_v56  ;;  %v222_v54 = vsub.s32 0, %v2279_v53  ;;  %v218_v55 = vld [vmem:[%s2309_s2] sm:$0x3]  ;;  %v226_v56 = vsub.s32 1, %v2279_v53  ;;  %vm1545_vm0 = vcmp.lt.s32.totalorder %v2279_v53, 2 }
  0x91   :  { %1015 = vmatprep.subr.bf16.mxu1 %v1993_v57 }
  0x92   :  { %v223_v57 = vrot.slane %v218_v55, %v222_v54 }
  0x93   :  { %975 = vmatpush2.bf16.msra.mxu0 %v1988_v58  ;;  %v227_v58 = vrot.slane %v218_v55, %v226_v56 }
  0x94   :  { %1016 = vmatpush2.bf16.msra.mxu1 %v1991_v59  ;;  %976 = vmatprep.subr.bf16.mxu0 %v1996_v60 }
  0x95   :  { %1017 = vmatprep.subr.bf16.mxu1 %v1999_v61 }
  0x97   :  { %977 = vmatpush2.bf16.msra.mxu0 %v1994_v62 }
  0x98   :  { %1018 = vmatpush2.bf16.msra.mxu1 %v1997_v63  ;;  %978 = vmatprep.subr.bf16.mxu0 %v2002_v0 }
  0x99   :  { %1019 = vmatprep.subr.bf16.mxu1 %v2005_v1 }
  0x9b   :  { %979 = vmatpush2.bf16.msra.mxu0 %v2000_v2 }
  0x9c   :  { %1020 = vmatpush2.bf16.msra.mxu1 %v2003_v3  ;;  %980 = vmatprep.subr.bf16.mxu0 %v2008_v4 }
  0x9d   :  { %1021 = vmatprep.subr.bf16.mxu1 %v2011_v5 }
  0x9f   :  { %981 = vmatpush2.bf16.msra.mxu0 %v2006_v6 }
  0xa0   :  { %1022 = vmatpush2.bf16.msra.mxu1 %v2009_v7  ;;  %982 = vmatprep.subr.bf16.mxu0 %v2014_v8 }
  0xa1   :  { %1023 = vmatprep.subr.bf16.mxu1 %v2017_v9 }
  0xa3   :  { %983 = vmatpush2.bf16.msra.mxu0 %v2012_v10 }
  0xa4   :  { %1024 = vmatpush2.bf16.msra.mxu1 %v2015_v11  ;;  %1766 = vmatprep.subr.bf16.mxu0 %v2018_v16  ;;  %v2052_v16 = vld [vmem:[#allocation4 + $0x10] ss:$8 sps:$4 sm:$0xff]  }
  0xa5   :  { %1323 = vmatprep.subr.bf16.mxu1 %v2036_v33  ;;  %v1716_v33 = vld [vmem:[%s2311_s4] ss:$0 sm:$0xff] }
  0xa6   :  { %985 = vmatmul.mubr.bf16.vlgmr.msra.gmra.mxu0 %v86_v14 }
  0xa7   :  { %1026 = vmatmul.mubr.bf16.vlgmr.msra.gmra.mxu1 %v88_v15  ;;  %1767 = vmatpush3.bf16.msra.mxu0 %v2019_v17  ;;  %v2054_v15 = vld [vmem:[#allocation4 + $0x14] ss:$8 sps:$4 sm:$0xff]   ;;  %v2057_v17 = vld [vmem:[#allocation4 + $0x4] ss:$8 sps:$4 sm:$0xff]  }
  0xa8   :  { %1768 = vmatprep.subr.bf16.mxu0 %v2020_v18  ;;  %1324 = vmatpush1.bf16.msra.mxu1 %v2034_v32  ;;  %v2055_v18 = vld [vmem:[#allocation4] ss:$8 sps:$4 sm:$0xff]  }
  0xa9   :  { %1325 = vmatprep.subr.bf16.mxu1 %v2039_v34 }
  0xab   :  { %1769 = vmatpush3.bf16.msra.mxu0 %v2021_v19  ;;  %v2145_v19 = vmov 0  }
  0xac   :  { %1770 = vmatprep.subr.bf16.mxu0 %v2022_v20  ;;  %1326 = vmatpush1.bf16.msra.mxu1 %v2037_v35  ;;  %v2058_v20 = vld [vmem:[#allocation6 + $0x78] sm:$0xff]  }
  0xad   :  { %1327 = vmatprep.subr.bf16.mxu1 %v2042_v36  ;;  %1355 = vmatprep.mubr.bf16.mxu1 %v2145_v19 }
  0xaf   :  { %1771 = vmatpush3.bf16.msra.mxu0 %v2023_v21  ;;  %v2059_v21 = vld [vmem:[#allocation6 + $0x38] sm:$0xff]  }
  0xb0   :  { %1772 = vmatprep.subr.bf16.mxu0 %v2024_v22  ;;  %1328 = vmatpush1.bf16.msra.mxu1 %v2040_v37  ;;  %v2060_v22 = vld [vmem:[#allocation6 + $0x70] sm:$0xff]  }
  0xb1   :  { %1329 = vmatprep.subr.bf16.mxu1 %v2045_v38 }
  0xb3   :  { %1773 = vmatpush3.bf16.msra.mxu0 %v2025_v23  ;;  %v2061_v23 = vld [vmem:[#allocation6 + $0x30] sm:$0xff]  }
  0xb4   :  { %1774 = vmatprep.subr.bf16.mxu0 %v2026_v24  ;;  %1330 = vmatpush1.bf16.msra.mxu1 %v2043_v39  ;;  %v2062_v24 = vld [vmem:[#allocation6 + $0x68] sm:$0xff]  }
  0xb5   :  { %1331 = vmatprep.subr.bf16.mxu1 %v2048_v40 }
  0xb7   :  { %1775 = vmatpush3.bf16.msra.mxu0 %v2027_v25  ;;  %v2063_v25 = vld [vmem:[#allocation6 + $0x28] sm:$0xff]  }
  0xb8   :  { %1776 = vmatprep.subr.bf16.mxu0 %v2028_v26  ;;  %1332 = vmatpush1.bf16.msra.mxu1 %v2046_v41  ;;  %v2064_v26 = vld [vmem:[#allocation6 + $0x60] sm:$0xff]   ;;  %v2070_v41 = vld [vmem:[#allocation6 + $0x48] sm:$0xff]  }
  0xb9   :  { %1333 = vmatprep.subr.bf16.mxu1 %v2051_v42  ;;  %v2071_v42 = vld [vmem:[#allocation6 + $0x8] sm:$0xff]  }
  0xbb   :  { %1777 = vmatpush3.bf16.msra.mxu0 %v2029_v27  ;;  %v2065_v27 = vld [vmem:[#allocation6 + $0x20] sm:$0xff]  }
  0xbc   :  { %1778 = vmatprep.subr.bf16.mxu0 %v2030_v28  ;;  %1334 = vmatpush1.bf16.msra.mxu1 %v2049_v43  ;;  %v2066_v28 = vld [vmem:[#allocation6 + $0x58] sm:$0xff]   ;;  %v2072_v43 = vld [vmem:[#allocation6 + $0x40] sm:$0xff]  }
  0xbd   :  { %1335 = vmatprep.subr.bf16.mxu1 %v2054_v15 }
  0xbf   :  { %1779 = vmatpush3.bf16.msra.mxu0 %v2031_v29  ;;  %v2067_v29 = vld [vmem:[#allocation6 + $0x18] sm:$0xff]  }
  0xc0   :  { %1780 = vmatprep.subr.bf16.mxu0 %v2032_v30  ;;  %1336 = vmatpush1.bf16.msra.mxu1 %v2052_v16  ;;  %v2068_v30 = vld [vmem:[#allocation6 + $0x50] sm:$0xff]  }
  0xc1   :  { %1337 = vmatprep.subr.bf16.mxu1 %v2057_v17 }
  0xc3   :  { %1781 = vmatpush3.bf16.msra.mxu0 %v2033_v31  ;;  %v2069_v31 = vld [vmem:[#allocation6 + $0x10] sm:$0xff]  }
  0xc4   :  { %1338 = vmatpush1.bf16.msra.mxu1 %v2055_v18  ;;  %1788 = vmatprep.subr.bf16.mxu0 %v2058_v20 }
 0x126   :  { %v904_v44 = vpop.f32.mrf.mxu0 }
 0x127   :  { %v945_v45 = vpop.f32.mrf.mxu1  ;;  %v905_v59 = vadd.f32 %v904_v44, %v223_v57  ;;  %v2073_v44 = vld [vmem:[#allocation6] sm:$0xff]  }
 0x128   :  { %v906_v46 = vpop.f32.mrf.mxu0 }
 0x129   :  { %v947_v47 = vpop.f32.mrf.mxu1  ;;  %v907_v60 = vadd.f32 %v906_v46, %v227_v58  ;;  %v946_v61 = vadd.f32 %v945_v45, %v905_v59  ;;  %v1231_v45 = vld [vmem:[%s2313_s6] sm:$0x3] }
 0x12a   :  { %v908_v48 = vpop.f32.mrf.mxu0  ;;  %v1236_v46 = vrot.slane %v1231_v45, %v222_v54  ;;  %v1749_v54 = vld [vmem:[%s2315_s8] ss:$0 sm:$0xff] }
 0x12b   :  { %v949_v49 = vpop.f32.mrf.mxu1  ;;  %v948_v0 = vadd.f32 %v947_v47, %v907_v60  ;;  %v1240_v47 = vrot.slane %v1231_v45, %v226_v56 }
 0x12c   :  { %v909_v50 = vpop.f32.mrf.mxu0 }
 0x12d   :  { %v950_v51 = vpop.f32.mrf.mxu1 }
 0x166   :  { %v986_v62 = vpop.f32.mrf.mxu0 }
 0x167   :  { %v1027_v63 = vpop.f32.mrf.mxu1  ;;  %v987_v1 = vadd.f32 %v986_v62, %v946_v61  ;;  %v2146_v61 = vmov 127  }
 0x168   :  { %v988_v2 = vpop.f32.mrf.mxu0  ;;  %1824 = vset.pattern.permute.xlu1 %v2146_v61  ;;  %1825 = vset.pattern.permute.xlu0 %v2146_v61 }
 0x169   :  { %v1029_v3 = vpop.f32.mrf.mxu1  ;;  %v1028_v4 = vadd.f32 %v1027_v63, %v987_v1  ;;  %v989_v5 = vadd.f32 %v988_v2, %v948_v0 }
 0x16a   :  { %v990_v6 = vpop.f32.mrf.mxu0 }
 0x16b   :  { %v1031_v7 = vpop.f32.mrf.mxu1  ;;  %v1030_v8 = vadd.f32 %v1029_v3, %v989_v5  ;;  %v1034_v9 = vmax.f32 %v1028_v4, 0.0 }
 0x16c   :  { %v991_v10 = vpop.f32.mrf.mxu0 }
 0x16d   :  { %v1032_v11 = vpop.f32.mrf.mxu1  ;;  %v1035_v12 = vmax.f32 %v1030_v8, 0.0  ;;  %v1036_v14 = vpack.c.bf16 %v1034_v9, %v1034_v9 }
 0x16f   :  { %v1037_v13 = vpack.c.bf16 %v1035_v12, %v1035_v12 }
 0x171   :  { %1205 = vmatprep.mubr.bf16.mxu0 %v1037_v13 }
 0x172   :  { %1206 = vmatmul.mubr.bf16.vlgmr.msra.gmra.mxu0 %v1036_v14 }
 0x173   :  { %1789 = vmatpush3.bf16.msra.mxu0 %v2059_v21 }
 0x174   :  { %1790 = vmatprep.subr.bf16.mxu0 %v2060_v22 }
 0x177   :  { %1791 = vmatpush3.bf16.msra.mxu0 %v2061_v23 }
 0x178   :  { %1792 = vmatprep.subr.bf16.mxu0 %v2062_v24 }
 0x17b   :  { %1793 = vmatpush3.bf16.msra.mxu0 %v2063_v25 }
 0x17c   :  { %1794 = vmatprep.subr.bf16.mxu0 %v2064_v26 }
 0x17f   :  { %1795 = vmatpush3.bf16.msra.mxu0 %v2065_v27 }
 0x180   :  { %1796 = vmatprep.subr.bf16.mxu0 %v2066_v28 }
 0x183   :  { %1797 = vmatpush3.bf16.msra.mxu0 %v2067_v29 }
 0x184   :  { %1798 = vmatprep.subr.bf16.mxu0 %v2068_v30 }
 0x187   :  { %1799 = vmatpush3.bf16.msra.mxu0 %v2069_v31 }
 0x188   :  { %1800 = vmatprep.subr.bf16.mxu0 %v2070_v41 }
 0x18b   :  { %1801 = vmatpush3.bf16.msra.mxu0 %v2071_v42 }
 0x18c   :  { %1802 = vmatprep.subr.bf16.mxu0 %v2072_v43 }
 0x18f   :  { %1803 = vmatpush3.bf16.msra.mxu0 %v2073_v44 }
 0x232   :  { %v1782_v32 = vpop.f32.mrf.mxu0 }
 0x234   :  { %v1783_v34 = vpop.f32.mrf.mxu0 }
 0x235   :  { %v1784_v35 = vadd.f32 %v1783_v34, %v1782_v32 }
 0x236   :  { %v1785_v36 = vpop.f32.mrf.mxu0 }
 0x237   :  { %v1208_v37 = vadd.f32 %v1784_v35, %v1716_v33 }
 0x238   :  { %v1786_v38 = vpop.f32.mrf.mxu0 }
 0x239   :  { %v1213_v39 = vmax.f32 %v1208_v37, 0.0 }
 0x23b   :  { %v1214_v40 = vpack.c.bf16 %v1213_v39, %v1213_v39 }
 0x23d   :  { %1356 = vmatmul.mubr.bf16.vlgmr.msra.gmra.mxu1 %v1214_v40 }
 0x2fd   :  { %v1357_v48 = vpop.f32.mrf.mxu1 }
 0x2fe   :  { %v1358_v49 = vadd.f32 %v1357_v48, %v1236_v46 }
 0x2ff   :  { %v1359_v50 = vpop.f32.mrf.mxu1 }
 0x300   :  { %v1360_v51 = vadd.f32 %v1359_v50, %v1240_v47  ;;  %v1364_v52 = vmax.f32 %v1358_v49, 0.0 }
 0x301   :  { %v1361_v55 = vpop.f32.mrf.mxu1 }
 0x302   :  { %v1365_v57 = vmax.f32 %v1360_v51, 0.0  ;;  %v1366_v60 = vpack.c.bf16 %v1364_v52, %v1364_v52 }
 0x303   :  { %v1362_v58 = vpop.f32.mrf.mxu1 }
 0x304   :  { %v1367_v59 = vpack.c.bf16 %v1365_v57, %v1365_v57 }
 0x306   :  { %1535 = vmatprep.mubr.bf16.mxu0 %v1367_v59 }
 0x307   :  { %1536 = vmatmul.mubr.bf16.vlgmr.msra.gmra.mxu0 %v1366_v60 }
 0x3c7   :  { %v1804_v62 = vpop.f32.mrf.mxu0 }
 0x3c9   :  { %v1805_v56 = vpop.f32.mrf.mxu0 }
 0x3ca   :  { %v1806_v63 = vadd.f32 %v1805_v56, %v1804_v62 }
 0x3cb   :  { %v1807_v0 = vpop.f32.mrf.mxu0 }
 0x3cc   :  { %v1538_v1 = vadd.f32 %v1806_v63, %v1749_v54 }
 0x3cd   :  { %v1808_v2 = vpop.f32.mrf.mxu0 }
 0x3ce   :  { %v1546_v3 = vsel %vm1545_vm0, %v1538_v1, 0.0 }
 0x3cf   :  { %1557 = vrot.lane.b32.xlu0 %v1546_v3, %s2147_s27 }
 0x3ee   :  { %1547 = vadd.xlane.f32.xlu0 %v1546_v3 }
 0x441   :  { %v1558_v4 = vpop.permute.xlu0 %1557 }
 0x442   :  { %v1561_v5 = vsel %vm1560_vm1, %v1558_v4, 0.0 }
 0x443   :  { %1562 = vadd.xlane.f32.xlu1 %v1561_v5 }
 0x454   :  { %1577 = vperm.xlu1 %1824, %v1538_v1  }
 0x477   :  { %v1548_v6 = vpop.xlane.xlu0 %1547 }
 0x478   :  { %v1549_v7 = vrot.slane %v1548_v6, 4 }
 0x47a   :  { %v1550_v8 = vadd.f32 %v1549_v7, %v1548_v6 }
 0x47c   :  { %v1551_v9 = vrot.slane %v1550_v8, 2 }
 0x47e   :  { %v1552_v10 = vadd.f32 %v1551_v9, %v1550_v8 }
 0x480   :  { %v1553_v11 = vrot.slane %v1552_v10, 1 }
 0x482   :  { %v1554_v12 = vadd.f32 %v1553_v11, %v1552_v10 }
 0x484   :  { %1810 = vpush %v1554_v12 }
 0x4b5   :  { %s1811_s8 = spop %1810 }
 0x4cc   :  { %v1563_v53 = vpop.xlane.xlu1 %1562 }
 0x4cd   :  { %v1564_v13 = vrot.slane %v1563_v53, 4 }
 0x4cf   :  { %v1565_v14 = vadd.f32 %v1564_v13, %v1563_v53 }
 0x4d0   :  { %v1578_v21 = vpop.permute.xlu1 %1577 }
 0x4d1   :  { %v1566_v15 = vrot.slane %v1565_v14, 2 }
 0x4d3   :  { %v1567_v16 = vadd.f32 %v1566_v15, %v1565_v14 }
 0x4d5   :  { %v1568_v17 = vrot.slane %v1567_v16, 1 }
 0x4d7   :  { %v1569_v18 = vadd.f32 %v1568_v17, %v1567_v16 }
 0x4d9   :  { %1812 = vpush %v1569_v18 }
 0x50a   :  { %s1813_s28 = spop %1812 }
 0x50b   :  { %s1571_s29 = ssub.f32 %s1811_s8, %s1813_s28 }
 0x50d   :  { %s1572_s30 = smul.f32 0.083333336, %s1571_s29 }
 0x50f   :  { %v1573_v19 = vstv %s1572_s30 }
 0x510   :  { %v1574_v20 = vsub.f32 %v1538_v1, %v1573_v19 }
 0x512   :  { %v1580_v22 = vadd.f32 %v1578_v21, %v1574_v20 }
 0x514   :  { %1581 = vst [vmem:[%s2316_s9] sm:$0xff] %v1580_v22 }
 0x515   :  { %1586 = vsyncpa [#allocation3], 1 }
 0x516   :  { %1587 = vsyncpa [#allocation5], 1 }

</bundles_post_ra>
